<compile_context>
chip_gen: v6e
topology: v6e:2x2x1
jax: 0.10.0
libtpu: 0.0.40
codegen_flags: <defaults>
</compile_context>

<pallas_src>
import functools

import numpy as np

import jax
import jax.numpy as jnp
from jax.experimental import pallas as pl
from jax.experimental.pallas import tpu as pltpu

LANE = 128        # lane-dense padding of every feature dimension
SUBLANE = 8       # sublane granularity for the batch dimension
NEG_BIG = -1e30   # padded logvar -> exp(0.5 * logvar) == 0.0 exactly in f32


def _round_up(v, m):
    return (v + m - 1) // m * m


# ----------------------------------------------------------------------------
# Kernel 1: hoisted reparameterization sample (runs ONCE per forward, per
# parameter tensor):  out = eps * exp(0.5 * logvar) + mean
# ----------------------------------------------------------------------------
def sample_param_kernel(eps_ref, mean_ref, logvar_ref, o_ref):
    sigma = jnp.exp(0.5 * logvar_ref[...])            # padded entries -> 0.0
    o_ref[...] = (eps_ref[...] * sigma + mean_ref[...]).astype(o_ref.dtype)


def _sample_param(eps, mean, logvar, out_dtype):
    shape = mean.shape                                 # (Pin, Pout) or (1, Pout)
    spec = pl.BlockSpec(shape, lambda i: (0,) * len(shape))
    return pl.pallas_call(
        sample_param_kernel,
        out_shape=jax.ShapeDtypeStruct(shape, out_dtype),
        grid=(1,),
        in_specs=[spec, spec, spec],
        out_specs=spec,
    )(eps, mean, logvar)


# ----------------------------------------------------------------------------
# Kernel 2: fused MLP over one batch tile.  Weights/biases are already sampled
# (constant block index -> VMEM resident across the batch grid).
# ----------------------------------------------------------------------------
def bnn_mlp_kernel(x_ref, *refs):
    o_ref = refs[-1]
    params = refs[:-1]
    num_layers = len(params) // 2

    h = x_ref[...]                                     # (tm, P0) f32
    for l in range(num_layers):                        # static, small live set
        w = params[2 * l][...]                         # (Pin_l, Pout_l) compute_dtype
        b = params[2 * l + 1][...]                     # (1, Pout_l)     compute_dtype
        h = jnp.dot(h.astype(w.dtype), w, preferred_element_type=jnp.float32)
        h = h + b.astype(jnp.float32)
        if l < num_layers - 1:                         # hidden layers use relu
            h = jnp.maximum(h, 0.0)
    o_ref[...] = h.astype(o_ref.dtype)


# ----------------------------------------------------------------------------
# Forward wrapper
# ----------------------------------------------------------------------------
def bnn_vi_forward(x, key, w_means, w_logvars, b_means, b_logvars, *,
                   out_dim, compute_dtype=jnp.bfloat16, block_m=256):
    """x: (MB, in_dim) f32  ->  (MB, out_dim) f32."""
    mb, in_dim = x.shape
    num_layers = len(w_means)
    p_in0 = w_means[0].shape[0]
    p_out_last = w_means[-1].shape[1]
    itemsize_c = np.dtype(compute_dtype).itemsize

    # --- 1) Hoisted reparameterization sample (once per forward). -----------
    keys = jax.random.split(key, 2 * num_layers)
    w_s, b_s = [], []
    for l in range(num_layers):
        eps_w = jax.random.normal(keys[2 * l], w_means[l].shape, jnp.float32)
        eps_b = jax.random.normal(keys[2 * l + 1], b_means[l].shape, jnp.float32)
        w_s.append(_sample_param(eps_w, w_means[l], w_logvars[l], compute_dtype))
        b_s.append(_sample_param(eps_b, b_means[l], b_logvars[l], compute_dtype))

    # --- 2) Batch padding / tiling. ------------------------------------------
    mb8 = _round_up(max(mb, SUBLANE), SUBLANE)
    tm = min(block_m, mb8)
    mb_pad = _round_up(mb8, tm)
    x_pad = jnp.zeros((mb_pad, p_in0), jnp.float32).at[:mb, :in_dim].set(
        x.astype(jnp.float32))

    # --- 3) Fused MLP over batch tiles. --------------------------------------
    in_specs = [pl.BlockSpec((tm, p_in0), lambda m: (m, 0))]
    operands = [x_pad]
    flops = 0
    weight_bytes = 0
    for l in range(num_layers):
        pin, pout = w_means[l].shape
        in_specs.append(pl.BlockSpec((pin, pout), lambda m: (0, 0)))   # weight
        in_specs.append(pl.BlockSpec((1, pout), lambda m: (0, 0)))     # bias
        operands += [w_s[l], b_s[l]]
        flops += 2 * mb_pad * pin * pout
        weight_bytes += (pin * pout + pout) * itemsize_c

    x_bytes = mb_pad * p_in0 * 4
    out_bytes = mb_pad * p_out_last * 4
    io_tile_bytes = 2 * (tm * p_in0 * 4 + tm * p_out_last * 4)   # double-buffered tiles
    vmem_limit = int(min(100 * 2**20,
                         max(32 * 2**20, 2 * weight_bytes + io_tile_bytes + (4 << 20))))

    out = pl.pallas_call(
        bnn_mlp_kernel,
        out_shape=jax.ShapeDtypeStruct((mb_pad, p_out_last), jnp.float32),
        grid=(mb_pad // tm,),
        in_specs=in_specs,
        out_specs=pl.BlockSpec((tm, p_out_last), lambda m: (m, 0)),
        compiler_params=pltpu.CompilerParams(
            dimension_semantics=("parallel",),
            vmem_limit_bytes=vmem_limit,
        ),
        cost_estimate=pl.CostEstimate(
            flops=flops,
            transcendentals=0,
            bytes_accessed=x_bytes + out_bytes + weight_bytes,
        ),
    )(*operands)

    return out[:mb, :out_dim]


# ----------------------------------------------------------------------------
# Module mirroring the PyTorch BNN_VI stack of FC_VI layers.
# ----------------------------------------------------------------------------
class BNN_VI_Pallas:

    def __init__(self, dim_layer, number_layers, in_dim, out_dim, key):
        if number_layers == 0:
            dims = [(in_dim, out_dim)]
        else:
            dims = ([(in_dim, dim_layer)]
                    + [(dim_layer, dim_layer)] * (number_layers - 1)
                    + [(dim_layer, out_dim)])
        self.layer_dims = dims
        self.out_dim = out_dim

        w_means, w_logvars, b_means, b_logvars = [], [], [], []
        self.raw_params = []
        for (din, dout) in dims:
            key, k1, k2, k3, k4 = jax.random.split(key, 5)
            raw = dict(
                w_mean=jax.random.normal(k1, (din, dout), jnp.float32),
                w_logvar=jax.random.normal(k2, (din, dout), jnp.float32),
                b_mean=jax.random.normal(k3, (dout,), jnp.float32),
                b_logvar=jax.random.normal(k4, (dout,), jnp.float32),
            )
            self.raw_params.append(raw)

            # Per-layer lane-dense padding (no common max-P inflation).
            pin, pout = _round_up(din, LANE), _round_up(dout, LANE)
            w_means.append(jnp.zeros((pin, pout), jnp.float32)
                           .at[:din, :dout].set(raw["w_mean"]))
            w_logvars.append(jnp.full((pin, pout), NEG_BIG, jnp.float32)
                             .at[:din, :dout].set(raw["w_logvar"]))
            b_means.append(jnp.zeros((1, pout), jnp.float32)
                           .at[0, :dout].set(raw["b_mean"]))
            b_logvars.append(jnp.full((1, pout), NEG_BIG, jnp.float32)
                             .at[0, :dout].set(raw["b_logvar"]))

        self.w_means = tuple(w_means)
        self.w_logvars = tuple(w_logvars)
        self.b_means = tuple(b_means)
        self.b_logvars = tuple(b_logvars)

        self._fwd = jax.jit(
            bnn_vi_forward,
            static_argnames=("out_dim", "compute_dtype", "block_m"))

    def forward(self, x, key, compute_dtype=jnp.bfloat16):
        return self._fwd(x, key, self.w_means, self.w_logvars,
                         self.b_means, self.b_logvars,
                         out_dim=self.out_dim, compute_dtype=compute_dtype)


if __name__ == "__main__":
    root = jax.random.PRNGKey(0)
    k_param, k_x, k_fwd = jax.random.split(root, 3)

    # Small, module-consistent shapes: layers [16->32 relu, 32->32 relu, 32->8].
    batch, in_dim, dim_layer, out_dim, number_layers = 8, 16, 32, 8, 2

    model = BNN_VI_Pallas(dim_layer, number_layers, in_dim, out_dim, k_param)
    x = jax.random.normal(k_x, (batch, in_dim), jnp.float32)

    # 1) Stochastic forward (hoisted reparameterization sample, bf16 MXU path).
    out = jax.block_until_ready(model.forward(x, k_fwd))
    assert out.shape == (batch, out_dim), out.shape
    assert bool(jnp.all(jnp.isfinite(out)))

    # Same key -> identical weight sample -> identical output.
    out_again = jax.block_until_ready(model.forward(x, k_fwd))
    assert jnp.allclose(out, out_again)

    # 2) Exact check of the deterministic data path in f32: force every logvar
    #    to -1e30 so sampled weights collapse exactly to their means, compare
    #    against a pure-JAX reference MLP.
    wlv_det = tuple(jnp.full_like(w, NEG_BIG) for w in model.w_logvars)
    blv_det = tuple(jnp.full_like(b, NEG_BIG) for b in model.b_logvars)
    out_det = model._fwd(x, k_fwd, model.w_means, wlv_det,
                         model.b_means, blv_det,
                         out_dim=out_dim, compute_dtype=jnp.float32)
    out_det = jax.block_until_ready(out_det)

    h_ref = x
    for l, (din, dout) in enumerate(model.layer_dims):
        raw = model.raw_params[l]
        h_ref = jnp.dot(h_ref, raw["w_mean"],
                        precision=jax.lax.Precision.HIGHEST) + raw["b_mean"]
        if l < len(model.layer_dims) - 1:
            h_ref = jnp.maximum(h_ref, 0.0)
    assert jnp.allclose(out_det, h_ref, atol=1e-2, rtol=1e-2), \
        float(jnp.max(jnp.abs(out_det - h_ref)))

    # 3) bf16 compute path against the f32 reference (loose tolerance).
    out_det_bf16 = model._fwd(x, k_fwd, model.w_means, wlv_det,
                              model.b_means, blv_det,
                              out_dim=out_dim, compute_dtype=jnp.bfloat16)
    out_det_bf16 = jax.block_until_ready(out_det_bf16)
    scale = float(jnp.max(jnp.abs(h_ref))) + 1e-6
    assert float(jnp.max(jnp.abs(out_det_bf16 - h_ref))) <= 0.05 * scale + 0.05

    print("KERNEL_OK")
</pallas_src>

<mosaic_0001>
module attributes {stable_mosaic.version = 11 : i64} {
  func.func @sample_param_kernel(%arg0: i32, %arg1: memref<128x128xf32, #tpu.memory_space<vmem>>, %arg2: memref<128x128xf32, #tpu.memory_space<vmem>>, %arg3: memref<128x128xf32, #tpu.memory_space<vmem>>, %arg4: memref<128x128xbf16, #tpu.memory_space<vmem>>) attributes {dimension_semantics = [#tpu.dimension_semantics<arbitrary>], iteration_bounds = array<i64: 1>, scalar_prefetch = 0 : i64, scratch_operands = 0 : i64, tpu.core_type = #tpu.core_type<tc>, window_params = [{pipeline_mode = #tpu.pipeline_mode<synchronous>, transform_indices = @transform_0, window_bounds = array<i64: 128, 128>}, {pipeline_mode = #tpu.pipeline_mode<synchronous>, transform_indices = @transform_1, window_bounds = array<i64: 128, 128>}, {pipeline_mode = #tpu.pipeline_mode<synchronous>, transform_indices = @transform_2, window_bounds = array<i64: 128, 128>}, {pipeline_mode = #tpu.pipeline_mode<synchronous>, transform_indices = @transform_3, window_bounds = array<i64: 128, 128>}]} {
    %c0 = arith.constant 0 : index
    %c0_0 = arith.constant 0 : index
    %0 = vector.load %arg3[%c0, %c0_0] : memref<128x128xf32, #tpu.memory_space<vmem>>, vector<128x128xf32>
    %cst = arith.constant 5.000000e-01 : f32
    %1 = vector.broadcast %cst : f32 to vector<128x128xf32>
    %2 = arith.mulf %1, %0 : vector<128x128xf32>
    %3 = math.exp %2 : vector<128x128xf32>
    %c0_1 = arith.constant 0 : index
    %c0_2 = arith.constant 0 : index
    %4 = vector.load %arg1[%c0_1, %c0_2] : memref<128x128xf32, #tpu.memory_space<vmem>>, vector<128x128xf32>
    %5 = arith.mulf %4, %3 : vector<128x128xf32>
    %c0_3 = arith.constant 0 : index
    %c0_4 = arith.constant 0 : index
    %6 = vector.load %arg2[%c0_3, %c0_4] : memref<128x128xf32, #tpu.memory_space<vmem>>, vector<128x128xf32>
    %7 = arith.addf %5, %6 : vector<128x128xf32>
    %8 = arith.truncf %7 : vector<128x128xf32> to vector<128x128xbf16>
    %c0_5 = arith.constant 0 : index
    %c0_6 = arith.constant 0 : index
    %9 = vector.load %arg4[%c0_5, %c0_6] : memref<128x128xbf16, #tpu.memory_space<vmem>>, vector<128x128xbf16>
    tpu.vector_store %arg4[%c0_5, %c0_6], %8 {strides = array<i32>} : memref<128x128xbf16, #tpu.memory_space<vmem>>, vector<128x128xbf16>,
    return
  }
  func.func @transform_0(%arg0: i32) -> (i32, i32) {
    %c0_i32 = arith.constant 0 : i32
    %c0_i32_0 = arith.constant 0 : i32
    %c0_i32_1 = arith.constant 0 : i32
    return %c0_i32, %c0_i32_0 : i32, i32
  }
  func.func @transform_1(%arg0: i32) -> (i32, i32) {
    %c0_i32 = arith.constant 0 : i32
    %c0_i32_0 = arith.constant 0 : i32
    %c0_i32_1 = arith.constant 0 : i32
    return %c0_i32, %c0_i32_0 : i32, i32
  }
  func.func @transform_2(%arg0: i32) -> (i32, i32) {
    %c0_i32 = arith.constant 0 : i32
    %c0_i32_0 = arith.constant 0 : i32
    %c0_i32_1 = arith.constant 0 : i32
    return %c0_i32, %c0_i32_0 : i32, i32
  }
  func.func @transform_3(%arg0: i32) -> (i32, i32) {
    %c0_i32 = arith.constant 0 : i32
    %c0_i32_0 = arith.constant 0 : i32
    %c0_i32_1 = arith.constant 0 : i32
    return %c0_i32, %c0_i32_0 : i32, i32
  }
}

module attributes {stable_mosaic.version = 11 : i64} {
  func.func @sample_param_kernel(%arg0: i32, %arg1: memref<1x128xf32, #tpu.memory_space<vmem>>, %arg2: memref<1x128xf32, #tpu.memory_space<vmem>>, %arg3: memref<1x128xf32, #tpu.memory_space<vmem>>, %arg4: memref<1x128xbf16, #tpu.memory_space<vmem>>) attributes {dimension_semantics = [#tpu.dimension_semantics<arbitrary>], iteration_bounds = array<i64: 1>, scalar_prefetch = 0 : i64, scratch_operands = 0 : i64, tpu.core_type = #tpu.core_type<tc>, window_params = [{pipeline_mode = #tpu.pipeline_mode<synchronous>, transform_indices = @transform_0, window_bounds = array<i64: 1, 128>}, {pipeline_mode = #tpu.pipeline_mode<synchronous>, transform_indices = @transform_1, window_bounds = array<i64: 1, 128>}, {pipeline_mode = #tpu.pipeline_mode<synchronous>, transform_indices = @transform_2, window_bounds = array<i64: 1, 128>}, {pipeline_mode = #tpu.pipeline_mode<synchronous>, transform_indices = @transform_3, window_bounds = array<i64: 1, 128>}]} {
    %c0 = arith.constant 0 : index
    %c0_0 = arith.constant 0 : index
    %0 = vector.load %arg3[%c0, %c0_0] : memref<1x128xf32, #tpu.memory_space<vmem>>, vector<1x128xf32>
    %cst = arith.constant 5.000000e-01 : f32
    %1 = vector.broadcast %cst : f32 to vector<1x128xf32>
    %2 = arith.mulf %1, %0 : vector<1x128xf32>
    %3 = math.exp %2 : vector<1x128xf32>
    %c0_1 = arith.constant 0 : index
    %c0_2 = arith.constant 0 : index
    %4 = vector.load %arg1[%c0_1, %c0_2] : memref<1x128xf32, #tpu.memory_space<vmem>>, vector<1x128xf32>
    %5 = arith.mulf %4, %3 : vector<1x128xf32>
    %c0_3 = arith.constant 0 : index
    %c0_4 = arith.constant 0 : index
    %6 = vector.load %arg2[%c0_3, %c0_4] : memref<1x128xf32, #tpu.memory_space<vmem>>, vector<1x128xf32>
    %7 = arith.addf %5, %6 : vector<1x128xf32>
    %8 = arith.truncf %7 : vector<1x128xf32> to vector<1x128xbf16>
    %c0_5 = arith.constant 0 : index
    %c0_6 = arith.constant 0 : index
    %9 = vector.load %arg4[%c0_5, %c0_6] : memref<1x128xbf16, #tpu.memory_space<vmem>>, vector<1x128xbf16>
    tpu.vector_store %arg4[%c0_5, %c0_6], %8 {strides = array<i32>} : memref<1x128xbf16, #tpu.memory_space<vmem>>, vector<1x128xbf16>,
    return
  }
  func.func @transform_0(%arg0: i32) -> (i32, i32) {
    %c0_i32 = arith.constant 0 : i32
    %c0_i32_0 = arith.constant 0 : i32
    %c0_i32_1 = arith.constant 0 : i32
    return %c0_i32, %c0_i32_0 : i32, i32
  }
  func.func @transform_1(%arg0: i32) -> (i32, i32) {
    %c0_i32 = arith.constant 0 : i32
    %c0_i32_0 = arith.constant 0 : i32
    %c0_i32_1 = arith.constant 0 : i32
    return %c0_i32, %c0_i32_0 : i32, i32
  }
  func.func @transform_2(%arg0: i32) -> (i32, i32) {
    %c0_i32 = arith.constant 0 : i32
    %c0_i32_0 = arith.constant 0 : i32
    %c0_i32_1 = arith.constant 0 : i32
    return %c0_i32, %c0_i32_0 : i32, i32
  }
  func.func @transform_3(%arg0: i32) -> (i32, i32) {
    %c0_i32 = arith.constant 0 : i32
    %c0_i32_0 = arith.constant 0 : i32
    %c0_i32_1 = arith.constant 0 : i32
    return %c0_i32, %c0_i32_0 : i32, i32
  }
}

module attributes {stable_mosaic.version = 11 : i64} {
  func.func @bnn_mlp_kernel(%arg0: i32, %arg1: memref<8x128xf32, #tpu.memory_space<vmem>>, %arg2: memref<128x128xbf16, #tpu.memory_space<vmem>>, %arg3: memref<1x128xbf16, #tpu.memory_space<vmem>>, %arg4: memref<128x128xbf16, #tpu.memory_space<vmem>>, %arg5: memref<1x128xbf16, #tpu.memory_space<vmem>>, %arg6: memref<128x128xbf16, #tpu.memory_space<vmem>>, %arg7: memref<1x128xbf16, #tpu.memory_space<vmem>>, %arg8: memref<8x128xf32, #tpu.memory_space<vmem>>) attributes {dimension_semantics = [#tpu.dimension_semantics<parallel>], iteration_bounds = array<i64: 1>, scalar_prefetch = 0 : i64, scratch_operands = 0 : i64, tpu.core_type = #tpu.core_type<tc>, window_params = [{transform_indices = @transform_0, window_bounds = array<i64: 8, 128>}, {pipeline_mode = #tpu.pipeline_mode<synchronous>, transform_indices = @transform_1, window_bounds = array<i64: 128, 128>}, {pipeline_mode = #tpu.pipeline_mode<synchronous>, transform_indices = @transform_2, window_bounds = array<i64: 1, 128>}, {pipeline_mode = #tpu.pipeline_mode<synchronous>, transform_indices = @transform_3, window_bounds = array<i64: 128, 128>}, {pipeline_mode = #tpu.pipeline_mode<synchronous>, transform_indices = @transform_4, window_bounds = array<i64: 1, 128>}, {pipeline_mode = #tpu.pipeline_mode<synchronous>, transform_indices = @transform_5, window_bounds = array<i64: 128, 128>}, {pipeline_mode = #tpu.pipeline_mode<synchronous>, transform_indices = @transform_6, window_bounds = array<i64: 1, 128>}, {transform_indices = @transform_7, window_bounds = array<i64: 8, 128>}]} {
    %c0 = arith.constant 0 : index
    %c0_0 = arith.constant 0 : index
    %0 = vector.load %arg1[%c0, %c0_0] : memref<8x128xf32, #tpu.memory_space<vmem>>, vector<8x128xf32>
    %c0_1 = arith.constant 0 : index
    %c0_2 = arith.constant 0 : index
    %1 = vector.load %arg2[%c0_1, %c0_2] : memref<128x128xbf16, #tpu.memory_space<vmem>>, vector<128x128xbf16>
    %c0_3 = arith.constant 0 : index
    %c0_4 = arith.constant 0 : index
    %2 = vector.load %arg3[%c0_3, %c0_4] : memref<1x128xbf16, #tpu.memory_space<vmem>>, vector<1x128xbf16>
    %3 = arith.truncf %0 : vector<8x128xf32> to vector<8x128xbf16>
    %cst = arith.constant dense<0.000000e+00> : vector<8x128xf32>
    %4 = tpu.matmul %3, %1, %cst {dimension_numbers = #tpu.dot_dimension_numbers<[1], [0], [0], [1], [0, 0, 1, 1], [], []>} : vector<8x128xbf16>, vector<128x128xbf16>, vector<8x128xf32> -> vector<8x128xf32>
    %5 = arith.extf %2 : vector<1x128xbf16> to vector<1x128xf32>
    %6 = vector.broadcast %5 : vector<1x128xf32> to vector<8x128xf32>
    %7 = arith.addf %4, %6 : vector<8x128xf32>
    %cst_5 = arith.constant 0.000000e+00 : f32
    %8 = vector.broadcast %cst_5 : f32 to vector<8x128xf32>
    %9 = arith.maximumf %7, %8 : vector<8x128xf32>
    %c0_6 = arith.constant 0 : index
    %c0_7 = arith.constant 0 : index
    %10 = vector.load %arg4[%c0_6, %c0_7] : memref<128x128xbf16, #tpu.memory_space<vmem>>, vector<128x128xbf16>
    %c0_8 = arith.constant 0 : index
    %c0_9 = arith.constant 0 : index
    %11 = vector.load %arg5[%c0_8, %c0_9] : memref<1x128xbf16, #tpu.memory_space<vmem>>, vector<1x128xbf16>
    %12 = arith.truncf %9 : vector<8x128xf32> to vector<8x128xbf16>
    %cst_10 = arith.constant dense<0.000000e+00> : vector<8x128xf32>
    %13 = tpu.matmul %12, %10, %cst_10 {dimension_numbers = #tpu.dot_dimension_numbers<[1], [0], [0], [1], [0, 0, 1, 1], [], []>} : vector<8x128xbf16>, vector<128x128xbf16>, vector<8x128xf32> -> vector<8x128xf32>
    %14 = arith.extf %11 : vector<1x128xbf16> to vector<1x128xf32>
    %15 = vector.broadcast %14 : vector<1x128xf32> to vector<8x128xf32>
    %16 = arith.addf %13, %15 : vector<8x128xf32>
    %cst_11 = arith.constant 0.000000e+00 : f32
    %17 = vector.broadcast %cst_11 : f32 to vector<8x128xf32>
    %18 = arith.maximumf %16, %17 : vector<8x128xf32>
    %c0_12 = arith.constant 0 : index
    %c0_13 = arith.constant 0 : index
    %19 = vector.load %arg6[%c0_12, %c0_13] : memref<128x128xbf16, #tpu.memory_space<vmem>>, vector<128x128xbf16>
    %c0_14 = arith.constant 0 : index
    %c0_15 = arith.constant 0 : index
    %20 = vector.load %arg7[%c0_14, %c0_15] : memref<1x128xbf16, #tpu.memory_space<vmem>>, vector<1x128xbf16>
    %21 = arith.truncf %18 : vector<8x128xf32> to vector<8x128xbf16>
    %cst_16 = arith.constant dense<0.000000e+00> : vector<8x128xf32>
    %22 = tpu.matmul %21, %19, %cst_16 {dimension_numbers = #tpu.dot_dimension_numbers<[1], [0], [0], [1], [0, 0, 1, 1], [], []>} : vector<8x128xbf16>, vector<128x128xbf16>, vector<8x128xf32> -> vector<8x128xf32>
    %23 = arith.extf %20 : vector<1x128xbf16> to vector<1x128xf32>
    %24 = vector.broadcast %23 : vector<1x128xf32> to vector<8x128xf32>
    %25 = arith.addf %22, %24 : vector<8x128xf32>
    %c0_17 = arith.constant 0 : index
    %c0_18 = arith.constant 0 : index
    %26 = vector.load %arg8[%c0_17, %c0_18] : memref<8x128xf32, #tpu.memory_space<vmem>>, vector<8x128xf32>
    tpu.vector_store %arg8[%c0_17, %c0_18], %25 {strides = array<i32>} : memref<8x128xf32, #tpu.memory_space<vmem>>, vector<8x128xf32>,
    return
  }
  func.func @transform_0(%arg0: i32) -> (i32, i32) {
    %c0_i32 = arith.constant 0 : i32
    %c0_i32_0 = arith.constant 0 : i32
    return %arg0, %c0_i32 : i32, i32
  }
  func.func @transform_1(%arg0: i32) -> (i32, i32) {
    %c0_i32 = arith.constant 0 : i32
    %c0_i32_0 = arith.constant 0 : i32
    %c0_i32_1 = arith.constant 0 : i32
    return %c0_i32, %c0_i32_0 : i32, i32
  }
  func.func @transform_2(%arg0: i32) -> (i32, i32) {
    %c0_i32 = arith.constant 0 : i32
    %c0_i32_0 = arith.constant 0 : i32
    %c0_i32_1 = arith.constant 0 : i32
    return %c0_i32, %c0_i32_0 : i32, i32
  }
  func.func @transform_3(%arg0: i32) -> (i32, i32) {
    %c0_i32 = arith.constant 0 : i32
    %c0_i32_0 = arith.constant 0 : i32
    %c0_i32_1 = arith.constant 0 : i32
    return %c0_i32, %c0_i32_0 : i32, i32
  }
  func.func @transform_4(%arg0: i32) -> (i32, i32) {
    %c0_i32 = arith.constant 0 : i32
    %c0_i32_0 = arith.constant 0 : i32
    %c0_i32_1 = arith.constant 0 : i32
    return %c0_i32, %c0_i32_0 : i32, i32
  }
  func.func @transform_5(%arg0: i32) -> (i32, i32) {
    %c0_i32 = arith.constant 0 : i32
    %c0_i32_0 = arith.constant 0 : i32
    %c0_i32_1 = arith.constant 0 : i32
    return %c0_i32, %c0_i32_0 : i32, i32
  }
  func.func @transform_6(%arg0: i32) -> (i32, i32) {
    %c0_i32 = arith.constant 0 : i32
    %c0_i32_0 = arith.constant 0 : i32
    %c0_i32_1 = arith.constant 0 : i32
    return %c0_i32, %c0_i32_0 : i32, i32
  }
  func.func @transform_7(%arg0: i32) -> (i32, i32) {
    %c0_i32 = arith.constant 0 : i32
    %c0_i32_0 = arith.constant 0 : i32
    return %arg0, %c0_i32 : i32, i32
  }
}

</mosaic_0001>

<bundles_post_ra>
// kernel: bnn_vi_forward.10
= control target key start
LH: loop header
LB: loop body
LE: loop exit
PB: predicated region body
PF: predicated region fallthrough
CT: control target
= control target key end

     0   :  { %vm23_vm0 = vcmask 1040384   ;;  %vm24_vm1 = vsmask.f32 256  ;;  %s70_s2 = inlined_call_operand.vmem [shape: f32[1,128], index: 2, kind: input, shape index: {}]   ;;  %s71_s0 = inlined_call_operand.vmem [shape: f32[1,128], index: 0, kind: input, shape index: {}]   ;;  %s72_s1 = inlined_call_operand.vmem [shape: f32[1,128], index: 1, kind: input, shape index: {}]   ;;  %s73_s3 = inlined_call_operand.vmem [shape: bf16[1,128], index: 3, kind: output, shape index: {}]  }
   0x1   :  { %v14_v0 = vld [vmem:[%s70_s2] sm:$0x1]  ;;  %vm25_vm2 = vmand %vm23_vm0, %vm24_vm1 }
   0x2   :  { %v15_v1 = vmul.f32 0.5, %v14_v0  ;;  %v18_v3 = vld [vmem:[%s71_s0] sm:$0x1] }
   0x3   :  { %v20_v5 = vld [vmem:[%s72_s1] sm:$0x1] }
   0x4   :  { %v16_v2 = vmul.f32 1.442695, %v15_v1  ;;  %v26_v8 = vld [vmem:[%s73_s3] sm:$0x1] }
   0x6   :  { %33 = vpow2.f32 %v16_v2 }
  0x13   :  { %v34_v4 = vpop.eup %33 }
  0x14   :  { %v19_v6 = vmul.f32 %v34_v4, %v18_v3 }
  0x16   :  { %v21_v7 = vadd.f32 %v20_v5, %v19_v6 }
  0x18   :  { %v22_v9 = vpack.c.bf16 %v21_v7, %v21_v7 }
  0x1a   :  { %v27_v10 = vsel %vm25_vm2, %v22_v9, %v26_v8 }
  0x1b   :  { %28 = vst [vmem:[%s73_s3] sm:$0x1] %v27_v10 }

// kernel: bnn_vi_forward.9
= control target key start
LH: loop header
LB: loop body
LE: loop exit
PB: predicated region body
PF: predicated region fallthrough
CT: control target
= control target key end

     0   :  { %s525_s2 = inlined_call_operand.vmem [shape: f32[128,128], index: 2, kind: input, shape index: {}]   ;;  %s526_s0 = inlined_call_operand.vmem [shape: f32[128,128], index: 0, kind: input, shape index: {}]   ;;  %s527_s1 = inlined_call_operand.vmem [shape: f32[128,128], index: 1, kind: input, shape index: {}]   ;;  %s528_s3 = inlined_call_operand.vmem [shape: bf16[128,128], index: 3, kind: output, shape index: {}]  }
   0x1   :  { %v14_v0 = vld [vmem:[%s525_s2] sm:$0xff]  ;;  %v15_v1 = vld [vmem:[%s525_s2 + $0x8] sm:$0xff]  ;;  %v16_v4 = vld [vmem:[%s525_s2 + $0x10] sm:$0xff] }
   0x2   :  { %v30_v2 = vmul.f32 0.5, %v14_v0  ;;  %v31_v3 = vmul.f32 0.5, %v15_v1  ;;  %v17_v5 = vld [vmem:[%s525_s2 + $0x18] sm:$0xff]  ;;  %v32_v8 = vmul.f32 0.5, %v16_v4  ;;  %v18_v12 = vld [vmem:[%s525_s2 + $0x20] sm:$0xff]  ;;  %v19_v13 = vld [vmem:[%s525_s2 + $0x28] sm:$0xff] }
   0x3   :  { %v33_v9 = vmul.f32 0.5, %v17_v5  ;;  %v34_v14 = vmul.f32 0.5, %v18_v12  ;;  %v35_v15 = vmul.f32 0.5, %v19_v13  ;;  %v20_v16 = vld [vmem:[%s525_s2 + $0x30] sm:$0xff]  ;;  %v21_v17 = vld [vmem:[%s525_s2 + $0x38] sm:$0xff]  ;;  %v22_v23 = vld [vmem:[%s525_s2 + $0x40] sm:$0xff] }
   0x4   :  { %v46_v6 = vmul.f32 1.442695, %v30_v2  ;;  %v48_v7 = vmul.f32 1.442695, %v31_v3  ;;  %v50_v10 = vmul.f32 1.442695, %v32_v8 }
   0x5   :  { %v52_v11 = vmul.f32 1.442695, %v33_v9  ;;  %v54_v18 = vmul.f32 1.442695, %v34_v14  ;;  %v56_v19 = vmul.f32 1.442695, %v35_v15 }
   0x6   :  { %305 = vpow2.f32 %v46_v6  ;;  %v36_v20 = vmul.f32 0.5, %v20_v16  ;;  %v37_v21 = vmul.f32 0.5, %v21_v17  ;;  %v23_v24 = vld [vmem:[%s525_s2 + $0x48] sm:$0xff]  ;;  %v38_v26 = vmul.f32 0.5, %v22_v23  ;;  %v24_v28 = vld [vmem:[%s525_s2 + $0x50] sm:$0xff]  ;;  %v25_v29 = vld [vmem:[%s525_s2 + $0x58] sm:$0xff] }
   0x7   :  { %307 = vpow2.f32 %v48_v7  ;;  %v39_v27 = vmul.f32 0.5, %v23_v24  ;;  %v40_v32 = vmul.f32 0.5, %v24_v28  ;;  %v41_v33 = vmul.f32 0.5, %v25_v29  ;;  %v26_v35 = vld [vmem:[%s525_s2 + $0x60] sm:$0xff]  ;;  %v27_v36 = vld [vmem:[%s525_s2 + $0x68] sm:$0xff]  ;;  %v28_v43 = vld [vmem:[%s525_s2 + $0x70] sm:$0xff] }
   0x8   :  { %309 = vpow2.f32 %v50_v10  ;;  %v58_v22 = vmul.f32 1.442695, %v36_v20  ;;  %v60_v25 = vmul.f32 1.442695, %v37_v21  ;;  %v62_v30 = vmul.f32 1.442695, %v38_v26 }
   0x9   :  { %311 = vpow2.f32 %v52_v11  ;;  %v64_v31 = vmul.f32 1.442695, %v39_v27  ;;  %v66_v34 = vmul.f32 1.442695, %v40_v32  ;;  %v78_v37 = vld [vmem:[%s526_s0] sm:$0xff]  ;;  %v79_v38 = vld [vmem:[%s526_s0 + $0x8] sm:$0xff] }
   0xa   :  { %313 = vpow2.f32 %v54_v18  ;;  %v68_v39 = vmul.f32 1.442695, %v41_v33  ;;  %v42_v40 = vmul.f32 0.5, %v26_v35  ;;  %v43_v41 = vmul.f32 0.5, %v27_v36  ;;  %v110_v42 = vld [vmem:[%s527_s1] sm:$0xff]  ;;  %v29_v44 = vld [vmem:[%s525_s2 + $0x78] sm:$0xff] }
   0xb   :  { %315 = vpow2.f32 %v56_v19  ;;  %v80_v46 = vld [vmem:[%s526_s0 + $0x10] sm:$0xff]  ;;  %v44_v49 = vmul.f32 0.5, %v28_v43  ;;  %v111_v52 = vld [vmem:[%s527_s1 + $0x8] sm:$0xff]  ;;  %v81_v53 = vld [vmem:[%s526_s0 + $0x18] sm:$0xff]  ;;  %v45_v54 = vmul.f32 0.5, %v29_v44 }
   0xc   :  { %317 = vpow2.f32 %v58_v22  ;;  %v70_v47 = vmul.f32 1.442695, %v42_v40  ;;  %v72_v48 = vmul.f32 1.442695, %v43_v41  ;;  %v112_v57 = vld [vmem:[%s527_s1 + $0x10] sm:$0xff]  ;;  %v113_v62 = vld [vmem:[%s527_s1 + $0x18] sm:$0xff] }
   0xd   :  { %319 = vpow2.f32 %v60_v25  ;;  %v74_v58 = vmul.f32 1.442695, %v44_v49  ;;  %v82_v63 = vld [vmem:[%s526_s0 + $0x20] sm:$0xff]  ;;  %v76_v0 = vmul.f32 1.442695, %v45_v54  ;;  %v83_v3 = vld [vmem:[%s526_s0 + $0x28] sm:$0xff] }
   0xe   :  { %321 = vpow2.f32 %v62_v30  ;;  %v114_v6 = vld [vmem:[%s527_s1 + $0x20] sm:$0xff]  ;;  %v84_v7 = vld [vmem:[%s526_s0 + $0x30] sm:$0xff]  ;;  %v115_v12 = vld [vmem:[%s527_s1 + $0x28] sm:$0xff] }
   0xf   :  { %323 = vpow2.f32 %v64_v31  ;;  %v85_v13 = vld [vmem:[%s526_s0 + $0x38] sm:$0xff]  ;;  %v116_v16 = vld [vmem:[%s527_s1 + $0x30] sm:$0xff]  ;;  %v86_v22 = vld [vmem:[%s526_s0 + $0x40] sm:$0xff] }
  0x10   :  { %325 = vpow2.f32 %v66_v34  ;;  %v117_v21 = vld [vmem:[%s527_s1 + $0x38] sm:$0xff]  ;;  %v87_v25 = vld [vmem:[%s526_s0 + $0x48] sm:$0xff]  ;;  %v118_v28 = vld [vmem:[%s527_s1 + $0x40] sm:$0xff] }
  0x11   :  { %327 = vpow2.f32 %v68_v39  ;;  %v88_v29 = vld [vmem:[%s526_s0 + $0x50] sm:$0xff]  ;;  %v119_v34 = vld [vmem:[%s527_s1 + $0x48] sm:$0xff]  ;;  %v89_v35 = vld [vmem:[%s526_s0 + $0x58] sm:$0xff] }
  0x12   :  { %329 = vpow2.f32 %v70_v47  ;;  %v121_v43 = vld [vmem:[%s527_s1 + $0x58] sm:$0xff]  ;;  %v90_v44 = vld [vmem:[%s526_s0 + $0x60] sm:$0xff]  ;;  %v91_v47 = vld [vmem:[%s526_s0 + $0x68] sm:$0xff] }
  0x13   :  { %v306_v45 = vpop.eup %305  ;;  %331 = vpow2.f32 %v72_v48 }
  0x14   :  { %v308_v50 = vpop.eup %307  ;;  %v94_v51 = vmul.f32 %v306_v45, %v78_v37  ;;  %333 = vpow2.f32 %v74_v58 }
  0x15   :  { %v310_v55 = vpop.eup %309  ;;  %v95_v56 = vmul.f32 %v308_v50, %v79_v38  ;;  %335 = vpow2.f32 %v76_v0  ;;  %v120_v38 = vld [vmem:[%s527_s1 + $0x50] sm:$0xff]  ;;  %v122_v50 = vld [vmem:[%s527_s1 + $0x60] sm:$0xff] }
  0x16   :  { %v312_v59 = vpop.eup %311  ;;  %v126_v60 = vadd.f32 %v110_v42, %v94_v51  ;;  %v96_v61 = vmul.f32 %v310_v55, %v80_v46  ;;  %v92_v51 = vld [vmem:[%s526_s0 + $0x70] sm:$0xff] }
  0x17   :  { %v127_v1 = vadd.f32 %v111_v52, %v95_v56  ;;  %v97_v2 = vmul.f32 %v312_v59, %v81_v53  ;;  %v314_v4 = vpop.eup %313  ;;  %v123_v56 = vld [vmem:[%s527_s1 + $0x68] sm:$0xff] }
  0x18   :  { %v128_v5 = vadd.f32 %v112_v57, %v96_v61  ;;  %v316_v8 = vpop.eup %315  ;;  %v98_v11 = vmul.f32 %v314_v4, %v82_v63  ;;  %v93_v57 = vld [vmem:[%s526_s0 + $0x78] sm:$0xff] }
  0x19   :  { %v261_v9 = vpack.c.bf16 %v127_v1, %v126_v60  ;;  %v129_v10 = vadd.f32 %v113_v62, %v97_v2  ;;  %v318_v14 = vpop.eup %317  ;;  %v99_v15 = vmul.f32 %v316_v8, %v83_v3  ;;  %v124_v60 = vld [vmem:[%s527_s1 + $0x70] sm:$0xff]  ;;  %v125_v1 = vld [vmem:[%s527_s1 + $0x78] sm:$0xff] }
  0x1a   :  { %v320_v17 = vpop.eup %319  ;;  %v130_v19 = vadd.f32 %v114_v6, %v98_v11  ;;  %v100_v20 = vmul.f32 %v318_v14, %v84_v7 }
  0x1b   :  { %262 = vst [vmem:[%s528_s3] sm:$0xff] %v261_v9   ;;  %v266_v18 = vpack.c.bf16 %v129_v10, %v128_v5  ;;  %v131_v23 = vadd.f32 %v115_v12, %v99_v15  ;;  %v101_v24 = vmul.f32 %v320_v17, %v85_v13  ;;  %v322_v26 = vpop.eup %321 }
  0x1c   :  { %v132_v27 = vadd.f32 %v116_v16, %v100_v20  ;;  %v324_v30 = vpop.eup %323  ;;  %v102_v33 = vmul.f32 %v322_v26, %v86_v22 }
  0x1d   :  { %298 = vst [vmem:[%s528_s3 + $0x8] sm:$0xff] %v266_v18   ;;  %v271_v31 = vpack.c.bf16 %v131_v23, %v130_v19  ;;  %v133_v32 = vadd.f32 %v117_v21, %v101_v24  ;;  %v326_v36 = vpop.eup %325  ;;  %v103_v37 = vmul.f32 %v324_v30, %v87_v25 }
  0x1e   :  { %v328_v39 = vpop.eup %327  ;;  %v134_v41 = vadd.f32 %v118_v28, %v102_v33  ;;  %v104_v42 = vmul.f32 %v326_v36, %v88_v29 }
  0x1f   :  { %299 = vst [vmem:[%s528_s3 + $0x10] sm:$0xff] %v271_v31   ;;  %v276_v40 = vpack.c.bf16 %v133_v32, %v132_v27  ;;  %v135_v45 = vadd.f32 %v119_v34, %v103_v37  ;;  %v105_v46 = vmul.f32 %v328_v39, %v89_v35  ;;  %v330_v48 = vpop.eup %329 }
  0x20   :  { %v136_v49 = vadd.f32 %v120_v38, %v104_v42  ;;  %v332_v52 = vpop.eup %331  ;;  %v106_v55 = vmul.f32 %v330_v48, %v90_v44 }
  0x21   :  { %300 = vst [vmem:[%s528_s3 + $0x18] sm:$0xff] %v276_v40   ;;  %v281_v53 = vpack.c.bf16 %v135_v45, %v134_v41  ;;  %v137_v54 = vadd.f32 %v121_v43, %v105_v46  ;;  %v334_v58 = vpop.eup %333  ;;  %v107_v59 = vmul.f32 %v332_v52, %v91_v47 }
  0x22   :  { %v336_v61 = vpop.eup %335  ;;  %v138_v63 = vadd.f32 %v122_v50, %v106_v55  ;;  %v108_v0 = vmul.f32 %v334_v58, %v92_v51 }
  0x23   :  { %301 = vst [vmem:[%s528_s3 + $0x20] sm:$0xff] %v281_v53   ;;  %v286_v62 = vpack.c.bf16 %v137_v54, %v136_v49  ;;  %v139_v2 = vadd.f32 %v123_v56, %v107_v59  ;;  %v109_v3 = vmul.f32 %v336_v61, %v93_v57 }
  0x24   :  { %v140_v4 = vadd.f32 %v124_v60, %v108_v0 }
  0x25   :  { %302 = vst [vmem:[%s528_s3 + $0x28] sm:$0xff] %v286_v62   ;;  %v291_v5 = vpack.c.bf16 %v139_v2, %v138_v63  ;;  %v141_v6 = vadd.f32 %v125_v1, %v109_v3 }
  0x27   :  { %303 = vst [vmem:[%s528_s3 + $0x30] sm:$0xff] %v291_v5   ;;  %v296_v7 = vpack.c.bf16 %v141_v6, %v140_v4 }
  0x29   :  { %304 = vst [vmem:[%s528_s3 + $0x38] sm:$0xff] %v296_v7  }

// kernel: bnn_vi_forward.15
= control target key start
LH: loop header
LB: loop body
LE: loop exit
PB: predicated region body
PF: predicated region fallthrough
CT: control target
= control target key end

     0   :  { %v539_v1 = vmov 0.0   ;;  %vm540_vm0 = vmmov 0   ;;  %s699_s0 = inlined_call_operand.vmem [shape: f32[8,128], index: 0, kind: input, shape index: {}]   ;;  %s700_s1 = inlined_call_operand.vmem [shape: bf16[128,128], index: 1, kind: input, shape index: {}]   ;;  %s701_s2 = inlined_call_operand.vmem [shape: bf16[1,128], index: 2, kind: input, shape index: {}]   ;;  %s702_s3 = inlined_call_operand.vmem [shape: bf16[128,128], index: 3, kind: input, shape index: {}]   ;;  %s703_s4 = inlined_call_operand.vmem [shape: bf16[1,128], index: 4, kind: input, shape index: {}]   ;;  %s704_s5 = inlined_call_operand.vmem [shape: bf16[128,128], index: 5, kind: input, shape index: {}]   ;;  %s705_s6 = inlined_call_operand.vmem [shape: bf16[1,128], index: 6, kind: input, shape index: {}]   ;;  %s706_s7 = inlined_call_operand.hbm [shape: f32[8,128], index: 7, kind: output, shape index: {}]  }
   0x1   :  { %v493_v0 = vld [vmem:[%s700_s1 + $0x38] sm:$0xff]   ;;  %430 = vmatprep.subr.bf16.mxu0 %v539_v1  ;;  %450 = vmatprep.subr.bf16.mxu1 %v539_v1  ;;  %v494_v2 = vld [vmem:[%s700_s1 + $0x30] sm:$0xff]   ;;  %v495_v3 = vld [vmem:[%s700_s1 + $0x28] sm:$0xff]  }
   0x2   :  { %431 = vmatpush3.bf16.msra.mxu0 %v493_v0  ;;  %446 = vmatprep.mubr.msk.bf16.mxu0 %vm540_vm0, %v539_v1  ;;  %v501_v4 = vld [vmem:[%s702_s3 + $0x38] sm:$0xff]   ;;  %v496_v5 = vld [vmem:[%s700_s1 + $0x20] sm:$0xff]   ;;  %v502_v6 = vld [vmem:[%s702_s3 + $0x30] sm:$0xff]  }
   0x3   :  { %432 = vmatprep.subr.bf16.mxu0 %v539_v1  ;;  %466 = vmatprep.mubr.msk.bf16.mxu1 %vm540_vm0, %v539_v1  ;;  %v497_v7 = vld [vmem:[%s700_s1 + $0x18] sm:$0xff]   ;;  %v503_v8 = vld [vmem:[%s702_s3 + $0x28] sm:$0xff]   ;;  %v498_v9 = vld [vmem:[%s700_s1 + $0x10] sm:$0xff]  }
   0x4   :  { %451 = vmatpush3.bf16.msra.mxu1 %v501_v4  ;;  %v504_v10 = vld [vmem:[%s702_s3 + $0x20] sm:$0xff]  }
   0x5   :  { %452 = vmatprep.subr.bf16.mxu1 %v539_v1 }
   0x6   :  { %433 = vmatpush3.bf16.msra.mxu0 %v494_v2 }
   0x7   :  { %434 = vmatprep.subr.bf16.mxu0 %v539_v1 }
   0x8   :  { %453 = vmatpush3.bf16.msra.mxu1 %v502_v6 }
   0x9   :  { %454 = vmatprep.subr.bf16.mxu1 %v539_v1 }
   0xa   :  { %435 = vmatpush3.bf16.msra.mxu0 %v495_v3 }
   0xb   :  { %436 = vmatprep.subr.bf16.mxu0 %v539_v1 }
   0xc   :  { %455 = vmatpush3.bf16.msra.mxu1 %v503_v8 }
   0xd   :  { %456 = vmatprep.subr.bf16.mxu1 %v539_v1 }
   0xe   :  { %437 = vmatpush3.bf16.msra.mxu0 %v496_v5 }
   0xf   :  { %438 = vmatprep.subr.bf16.mxu0 %v539_v1 }
  0x12   :  { %439 = vmatpush3.bf16.msra.mxu0 %v497_v7 }
  0x13   :  { %440 = vmatprep.subr.bf16.mxu0 %v539_v1 }
  0x14   :  { %12 = vsyncpa [#allocation3], 0  ;;  %v499_v11 = vld [vmem:[%s700_s1 + $0x8] sm:$0xff]   ;;  %457 = vmatpush3.bf16.msra.mxu1 %v504_v10  ;;  %v505_v12 = vld [vmem:[%s702_s3 + $0x18] sm:$0xff]   ;;  %v48_v25 = vlaneseq }
  0x15   :  { %458 = vmatprep.subr.bf16.mxu1 %v539_v1  ;;  %v500_v13 = vld [vmem:[%s700_s1] sm:$0xff]   ;;  %v506_v15 = vld [vmem:[%s702_s3 + $0x10] sm:$0xff]   ;;  %v507_v17 = vld [vmem:[%s702_s3 + $0x8] sm:$0xff]  }
  0x16   :  { %441 = vmatpush3.bf16.msra.mxu0 %v498_v9  ;;  %v28_v14 = vld [vmem:[%s699_s0] sm:$0xff]  ;;  %v509_v19 = vld [vmem:[%s704_s5 + $0x38] sm:$0xff]   ;;  %v510_v20 = vld [vmem:[%s704_s5 + $0x30] sm:$0xff]   ;;  %v49_v26 = vshrl.u32 %v48_v25, 7 }
  0x17   :  { %442 = vmatprep.subr.bf16.mxu0 %v539_v1  ;;  %v46_v16 = vpack.c.bf16 %v28_v14, %v28_v14  ;;  %v508_v18 = vld [vmem:[%s702_s3] sm:$0xff]   ;;  %v511_v21 = vld [vmem:[%s704_s5 + $0x28] sm:$0xff]   ;;  %v513_v23 = vld [vmem:[%s704_s5 + $0x18] sm:$0xff]  }
  0x18   :  { %459 = vmatpush3.bf16.msra.mxu1 %v505_v12  ;;  %v512_v22 = vld [vmem:[%s704_s5 + $0x20] sm:$0xff]   ;;  %v514_v24 = vld [vmem:[%s704_s5 + $0x10] sm:$0xff]   ;;  %v50_v29 = vsub.s32 0, %v49_v26  ;;  %v515_v38 = vld [vmem:[%s704_s5 + $0x8] sm:$0xff]  }
  0x19   :  { %460 = vmatprep.subr.bf16.mxu1 %v539_v1  ;;  %v45_v27 = vld [vmem:[%s701_s2] sm:$0x1] }
  0x1a   :  { %443 = vmatpush3.bf16.msra.mxu0 %v499_v11  ;;  %v47_v28 = vunpack.c.l.bf16 %v45_v27  ;;  %v516_v39 = vld [vmem:[%s704_s5] sm:$0xff]   ;;  %s541_s5 = smov [#allocation2]  }
  0x1b   :  { %444 = vmatprep.subr.bf16.mxu0 %v539_v1  ;;  %v157_v40 = vld [vmem:[%s703_s4] sm:$0x1]  ;;  %s371_s30 = sshll.u32 %s541_s5, 4  ;;  %s372_s30 = int_to_ptr.vmem [resolvable:$true] %s371_s30 }
  0x1c   :  { %461 = vmatpush3.bf16.msra.mxu1 %v506_v15  ;;  %v51_v30 = vrot.slane %v47_v28, %v50_v29  ;;  %v159_v41 = vunpack.c.l.bf16 %v157_v40  ;;  %v269_v50 = vld [vmem:[%s705_s6] sm:$0x1]  ;;  %s517_s4 = scalar_lea.vmem %s372_s30, 128  ;;  %p522_p1 = scmp.lt.s32.totalorder %s372_s30, %s372_s30 }
  0x1d   :  { %462 = vmatprep.subr.bf16.mxu1 %v539_v1  ;;  %v271_v51 = vunpack.c.l.bf16 %v269_v50  ;;  %p518_p0 = scmp.ne.s32.totalorder %s372_s30, %s517_s4  ;;  %p523_p2 = scmp.lt.s32.totalorder %s517_s4, %s517_s4 }
  0x1e   :  { %445 = vmatpush3.bf16.msra.mxu0 %v500_v13  ;;  %v163_v42 = vrot.slane %v159_v41, %v50_v29 }
  0x1f   :  { %470 = vmatprep.subr.bf16.mxu0 %v539_v1  ;;  %v275_v52 = vrot.slane %v271_v51, %v50_v29  ;;  %p524_p3 = por %p523_p2, %p522_p1 }
  0x20   :  { %463 = vmatpush3.bf16.msra.mxu1 %v507_v17 }
  0x21   :  { %447 = vmatmul.mubr.bf16.vlgmr.msra.gmra.mxu0 %v46_v16  ;;  %464 = vmatprep.subr.bf16.mxu1 %v539_v1  ;;  %p525_p4 = pnand %p524_p3, %p518_p0 }
  0x22   :  { %486 = vmatprep.mubr.msk.bf16.mxu0 %vm540_vm0, %v539_v1  ;;  %471 = vmatpush3.bf16.msra.mxu0 %v509_v19 }
  0x23   :  { %472 = vmatprep.subr.bf16.mxu0 %v539_v1 }
  0x24   :  { %465 = vmatpush3.bf16.msra.mxu1 %v508_v18 }
  0x26   :  { %473 = vmatpush3.bf16.msra.mxu0 %v510_v20 }
  0x27   :  { %474 = vmatprep.subr.bf16.mxu0 %v539_v1 }
  0x2a   :  { %475 = vmatpush3.bf16.msra.mxu0 %v511_v21 }
  0x2b   :  { %476 = vmatprep.subr.bf16.mxu0 %v539_v1 }
  0x2e   :  { %477 = vmatpush3.bf16.msra.mxu0 %v512_v22 }
  0x2f   :  { %478 = vmatprep.subr.bf16.mxu0 %v539_v1 }
  0x32   :  { %479 = vmatpush3.bf16.msra.mxu0 %v513_v23 }
  0x33   :  { %480 = vmatprep.subr.bf16.mxu0 %v539_v1 }
  0x36   :  { %481 = vmatpush3.bf16.msra.mxu0 %v514_v24 }
  0x37   :  { %482 = vmatprep.subr.bf16.mxu0 %v539_v1 }
  0x3a   :  { %483 = vmatpush3.bf16.msra.mxu0 %v515_v38 }
  0x3b   :  { %484 = vmatprep.subr.bf16.mxu0 %v539_v1 }
  0x3e   :  { %485 = vmatpush3.bf16.msra.mxu0 %v516_v39 }
  0xe1   :  { %v134_v31 = vpop.f32.mrf.mxu0 }
  0xe2   :  { %v135_v32 = vadd.f32 %v134_v31, %v51_v30 }
  0xe3   :  { %v448_v33 = vpop.f32.mrf.mxu0 }
  0xe4   :  { %v140_v34 = vmax.f32 %v135_v32, 0.0 }
  0xe5   :  { %v137_v35 = vpop.f32.mrf.mxu0 }
  0xe6   :  { %v158_v36 = vpack.c.bf16 %v140_v34, %v140_v34 }
  0xe7   :  { %v449_v37 = vpop.f32.mrf.mxu0 }
  0xe8   :  { %467 = vmatmul.mubr.bf16.vlgmr.msra.gmra.mxu1 %v158_v36 }
 0x1a8   :  { %v246_v43 = vpop.f32.mrf.mxu1 }
 0x1a9   :  { %v247_v44 = vadd.f32 %v246_v43, %v163_v42 }
 0x1aa   :  { %v468_v45 = vpop.f32.mrf.mxu1 }
 0x1ab   :  { %v252_v46 = vmax.f32 %v247_v44, 0.0 }
 0x1ac   :  { %v249_v47 = vpop.f32.mrf.mxu1 }
 0x1ad   :  { %v270_v48 = vpack.c.bf16 %v252_v46, %v252_v46 }
 0x1ae   :  { %v469_v49 = vpop.f32.mrf.mxu1 }
 0x1af   :  { %487 = vmatmul.mubr.bf16.vlgmr.msra.gmra.mxu0 %v270_v48 }
 0x26f   :  { %v358_v53 = vpop.f32.mrf.mxu0 }
 0x270   :  { %v359_v54 = vadd.f32 %v358_v53, %v275_v52 }
 0x271   :  { %v488_v55 = vpop.f32.mrf.mxu0 }
 0x272   :  { %364 = vst [vmem:[#allocation2] sm:$0xff] %v359_v54 }
 0x273   :  { %v361_v56 = vpop.f32.mrf.mxu0 }
 0x274   :  { %528 = shalt.err (!%p525_p4)
}
 0x275   :  { %374 = dma.vmem_to_hbm [thread:$0]  %s372_s30, 128, %s706_s7, [#allocation3]   ;;  %v489_v57 = vpop.f32.mrf.mxu0 }
 0x276   :  { %537 = dma.done.wait [#allocation3], 128  }
 0x277   :  { %538 = vsyncadd [#allocation3], 4294967168 }
 0x278   :  { %378 = vsyncpa [#allocation3], 1 }

</bundles_post_ra>
